<compile_context>
chip_gen: v5e
topology: v5e:2x2
jax: 0.10.0
libtpu: 0.0.40
codegen_flags: <defaults>
</compile_context>

<pallas_src>
import functools

import jax
import jax.numpy as jnp
import numpy as np
from jax.experimental import pallas as pl
from jax.experimental.pallas import tpu as pltpu


def _featavgpool_kernel(*refs, kernel_size, stride, t_out_tile, use_pool_mat):
    if use_pool_mat:
        x_ref, w_ref, b_ref, p_ref, o_ref = refs
    else:
        x_ref, w_ref, b_ref, o_ref = refs
        p_ref = None

    # Pointwise Conv1d (k=1, s=1) == matmul: cast x to bf16 at the MXU input,
    # accumulate in f32.  Bias / ReLU / pooling stay f32 (v5e VPU has no bf16).
    x = x_ref[0].astype(jnp.bfloat16)                                # (t_in, C)
    y = jnp.dot(x, w_ref[...], preferred_element_type=jnp.float32)   # (t_in, Hp)
    y = jnp.maximum(y + b_ref[...], 0.0)

    hp = y.shape[-1]
    if not use_pool_mat:
        # kernel_size <= stride: windows never straddle a `stride` group, so
        # pooling is a reshape-reduce (no strided slices, no extra matmul).
        need = t_out_tile * stride
        if need > y.shape[0]:
            # Padded rows land only in the sliced-away tail of the last group.
            y = jnp.concatenate(
                [y, jnp.zeros((need - y.shape[0], hp), jnp.float32)], axis=0)
        win = y[:need, :].reshape(t_out_tile, stride, hp)
        pooled = win[:, :kernel_size, :].sum(axis=1) * (1.0 / kernel_size)
    else:
        # kernel_size > stride (overlapping windows): pooling-matrix matmul.
        # TODO(synk): for long T / small C this f32 matmul can dominate the MXU;
        # switch to k shifted VPU adds if that regime matters.
        pooled = jnp.dot(p_ref[...], y, preferred_element_type=jnp.float32)

    # Sublane-align the transpose source (trace-time no-op for aligned tiles).
    sub_pad = (-t_out_tile) % 8
    if sub_pad:
        pooled = jnp.concatenate(
            [pooled, jnp.zeros((sub_pad, hp), jnp.float32)], axis=0)

    # In-VMEM (XLU) transpose -> channels-first block; VMEM-only padding is
    # sliced off before the store, so the HBM output stays unpadded.
    pooled_t = pooled.T                                   # (Hp, t_out_pad)
    o_ref[0] = pooled_t[:o_ref.shape[1], :t_out_tile].astype(o_ref.dtype)


def _est_step_vmem_bytes(t_in_tile, t_out_tile, c, hp, h, x_itemsize):
    """Rough per-grid-step VMEM footprint (double-buffered blocks + temps)."""
    return (2 * t_in_tile * c * x_itemsize     # x blocks
            + 2 * c * hp * 2                   # bf16 weight blocks
            + 2 * hp * 4                       # bias blocks
            + 2 * h * t_out_tile * 4           # f32 output blocks
            + t_in_tile * hp * 4               # f32 conv+ReLU intermediate
            + 2 * t_out_tile * hp * 4)         # pooled + transposed temporaries


def feat_avg_pool(x, weight, bias, *, kernel_size: int, stride: int):
    """x: (N, T, C) channels-last.  weight: (C, H).  bias: (H,).

    Returns (N, H, T_out) float32, matching PyTorch's FeatAvgPool output.
    """
    n, t, c = x.shape
    h = weight.shape[1]
    t_out = (t - kernel_size) // stride + 1
    assert t_out >= 1, "pooling window larger than sequence"

    # --- explicit VMEM budget (v7x: 64 MiB physical, v5e: 16 MiB default) ----
    try:
        vmem_cap = int(pltpu.get_tpu_info().vmem_capacity_bytes)
    except Exception:
        vmem_cap = 64 << 20                       # conservative (v7x per-core)
    vmem_limit = min(vmem_cap * 3 // 4, 100 << 20)
    step_budget = int(vmem_limit * 0.85)
    tile_cap = 512 if vmem_cap > (80 << 20) else 256    # v6e/v5e vs. v7x
    x_itemsize = x.dtype.itemsize

    # --- lane padding of the hidden dim lives only in weights/VMEM -----------
    hp = ((h + 127) // 128) * 128

    # --- T tiling -------------------------------------------------------------
    use_pool_mat = kernel_size > stride
    if use_pool_mat:
        # TODO(synk): overlapping windows need halo'd T tiles; single T block.
        t_out_tile, t_in_tile = t_out, t
    else:
        tile = tile_cap
        while tile > 128 and _est_step_vmem_bytes(
                tile * stride, tile, c, hp, h, x_itemsize) > step_budget:
            tile //= 2
        if t_out > tile:
            t_out_tile, t_in_tile = tile, tile * stride
        elif n == 1 and t_out >= 256:
            # Guarantee >=2 "parallel" grid steps so both v7x cores get work.
            half = ((-(-t_out // 2) + 127) // 128) * 128
            t_out_tile, t_in_tile = half, half * stride
        else:
            t_out_tile, t_in_tile = t_out, t
    n_t_tiles = -(-t_out // t_out_tile)

    w_pad = jnp.zeros((c, hp), jnp.bfloat16).at[:, :h].set(
        weight.astype(jnp.bfloat16))                      # tiny, one-off
    b_pad = jnp.zeros((1, hp), jnp.float32).at[:, :h].set(
        bias.astype(jnp.float32))

    in_arrays = [x, w_pad, b_pad]
    in_specs = [
        pl.BlockSpec((1, t_in_tile, c), lambda b, ti: (b, ti, 0)),
        pl.BlockSpec((c, hp), lambda b, ti: (0, 0)),      # shared weight
        pl.BlockSpec((1, hp), lambda b, ti: (0, 0)),      # shared bias
    ]
    if use_pool_mat:
        rows = np.arange(t_out)[:, None]
        cols = np.arange(t)[None, :]
        p_np = (cols >= rows * stride) & (cols < rows * stride + kernel_size)
        in_arrays.append(jnp.asarray(p_np.astype(np.float32) / kernel_size))
        in_specs.append(pl.BlockSpec((t_out, t), lambda b, ti: (0, 0)))

    kernel = functools.partial(
        _featavgpool_kernel, kernel_size=kernel_size, stride=stride,
        t_out_tile=t_out_tile, use_pool_mat=use_pool_mat)

    return pl.pallas_call(
        kernel,
        out_shape=jax.ShapeDtypeStruct((n, h, t_out), jnp.float32),
        grid_spec=pltpu.PrefetchScalarGridSpec(
            num_scalar_prefetch=0,
            grid=(n, n_t_tiles),
            in_specs=in_specs,
            out_specs=pl.BlockSpec((1, h, t_out_tile),
                                   lambda b, ti: (b, 0, ti)),
        ),
        compiler_params=pltpu.CompilerParams(
            dimension_semantics=("parallel", "parallel"),
            vmem_limit_bytes=vmem_limit),
    )(*in_arrays)


def _reference(x, weight, bias, kernel_size, stride):
    # Pure-JAX reference of the PyTorch forward with the same numerics
    # (bf16 matmul inputs, f32 accumulation, f32 bias/ReLU/pooling).
    y = jnp.einsum("ntc,ch->nth",
                   x.astype(jnp.bfloat16), weight.astype(jnp.bfloat16),
                   preferred_element_type=jnp.float32)
    y = jnp.maximum(y + bias[None, None, :].astype(jnp.float32), 0.0)
    t = y.shape[1]
    t_out = (t - kernel_size) // stride + 1
    pooled = jnp.stack(
        [y[:, i * stride:i * stride + kernel_size, :].mean(axis=1)
         for i in range(t_out)], axis=1)                   # (N, T_out, H)
    return jnp.transpose(pooled, (0, 2, 1))                # (N, H, T_out)


if __name__ == "__main__":
    # module config: FeatAvgPool(input_size=32, hidden_size=64, kernel=2, stride=2)
    input_size, hidden_size = 32, 64
    kernel_size, stride = 2, 2
    N, T = 2, 16

    key = jax.random.PRNGKey(0)
    kx, kw, kb = jax.random.split(key, 3)

    # deterministic synthetic parameters (Conv1d weight (H, C, 1) -> (C, H))
    x = jax.random.normal(kx, (N, T, input_size), dtype=jnp.float32)
    conv_w = jax.random.normal(kw, (hidden_size, input_size, 1),
                               dtype=jnp.float32) * 0.1
    conv_b = jax.random.normal(kb, (hidden_size,), dtype=jnp.float32) * 0.1
    weight = jnp.transpose(conv_w[:, :, 0], (1, 0))        # (C, H)

    out = feat_avg_pool(x, weight, conv_b,
                        kernel_size=kernel_size, stride=stride)
    out = jax.block_until_ready(out)

    ref = _reference(x, weight, conv_b, kernel_size, stride)
    np.testing.assert_allclose(np.asarray(out), np.asarray(ref),
                               rtol=1e-3, atol=1e-3)
    print("KERNEL_OK")
</pallas_src>

<mosaic_0001>
module attributes {stable_mosaic.version = 11 : i64} {
  func.func @_featavgpool_kernel(%arg0: i32, %arg1: i32, %arg2: memref<1x16x32xf32, #tpu.memory_space<vmem>>, %arg3: memref<32x128xbf16, #tpu.memory_space<vmem>>, %arg4: memref<1x128xf32, #tpu.memory_space<vmem>>, %arg5: memref<1x64x8xf32, #tpu.memory_space<vmem>>) attributes {dimension_semantics = [#tpu.dimension_semantics<parallel>, #tpu.dimension_semantics<parallel>], iteration_bounds = array<i64: 2, 1>, scalar_prefetch = 0 : i64, scratch_operands = 0 : i64, tpu.core_type = #tpu.core_type<tc>, window_params = [{transform_indices = @transform_0, window_bounds = array<i64: 1, 16, 32>}, {pipeline_mode = #tpu.pipeline_mode<synchronous>, transform_indices = @transform_1, window_bounds = array<i64: 32, 128>}, {pipeline_mode = #tpu.pipeline_mode<synchronous>, transform_indices = @transform_2, window_bounds = array<i64: 1, 128>}, {transform_indices = @transform_3, window_bounds = array<i64: 1, 64, 8>}]} {
    %c0 = arith.constant 0 : index
    %c0_0 = arith.constant 0 : index
    %c0_1 = arith.constant 0 : index
    %0 = vector.load %arg2[%c0, %c0_0, %c0_1] : memref<1x16x32xf32, #tpu.memory_space<vmem>>, vector<1x16x32xf32>
    %1 = vector.shape_cast %0 : vector<1x16x32xf32> to vector<16x32xf32>
    %2 = arith.truncf %1 : vector<16x32xf32> to vector<16x32xbf16>
    %c0_2 = arith.constant 0 : index
    %c0_3 = arith.constant 0 : index
    %3 = vector.load %arg3[%c0_2, %c0_3] : memref<32x128xbf16, #tpu.memory_space<vmem>>, vector<32x128xbf16>
    %cst = arith.constant dense<0.000000e+00> : vector<16x128xf32>
    %4 = tpu.matmul %2, %3, %cst {dimension_numbers = #tpu.dot_dimension_numbers<[1], [0], [0], [1], [0, 0, 1, 1], [], []>} : vector<16x32xbf16>, vector<32x128xbf16>, vector<16x128xf32> -> vector<16x128xf32>
    %c0_4 = arith.constant 0 : index
    %c0_5 = arith.constant 0 : index
    %5 = vector.load %arg4[%c0_4, %c0_5] : memref<1x128xf32, #tpu.memory_space<vmem>>, vector<1x128xf32>
    %6 = vector.broadcast %5 : vector<1x128xf32> to vector<16x128xf32>
    %7 = arith.addf %4, %6 : vector<16x128xf32>
    %cst_6 = arith.constant 0.000000e+00 : f32
    %8 = vector.broadcast %cst_6 : f32 to vector<16x128xf32>
    %9 = arith.maximumf %7, %8 : vector<16x128xf32>
    %10 = vector.shape_cast %9 : vector<16x128xf32> to vector<8x2x128xf32>
    %cst_7 = arith.constant dense<0.000000e+00> : vector<8x128xf32>
    %11 = vector.multi_reduction <add>, %10, %cst_7 [1] : vector<8x2x128xf32> to vector<8x128xf32>
    %cst_8 = arith.constant 5.000000e-01 : f32
    %12 = vector.broadcast %cst_8 : f32 to vector<8x128xf32>
    %13 = arith.mulf %11, %12 : vector<8x128xf32>
    %14 = tpu.transpose %13, [1, 0] : vector<8x128xf32> -> vector<128x8xf32>
    %15 = vector.extract_strided_slice %14 {offsets = [0, 0], sizes = [64, 8], strides = [1, 1]} : vector<128x8xf32> to vector<64x8xf32>
    %c0_9 = arith.constant 0 : index
    %c0_10 = arith.constant 0 : index
    %c0_11 = arith.constant 0 : index
    %16 = vector.load %arg5[%c0_9, %c0_10, %c0_11] : memref<1x64x8xf32, #tpu.memory_space<vmem>>, vector<1x64x8xf32>
    %17 = vector.shape_cast %16 : vector<1x64x8xf32> to vector<64x8xf32>
    %18 = vector.shape_cast %15 : vector<64x8xf32> to vector<1x64x8xf32>
    tpu.vector_store %arg5[%c0_9, %c0_10, %c0_11], %18 {strides = array<i32>} : memref<1x64x8xf32, #tpu.memory_space<vmem>>, vector<1x64x8xf32>,
    return
  }
  func.func @transform_0(%arg0: i32, %arg1: i32) -> (i32, i32, i32) {
    %c0_i32 = arith.constant 0 : i32
    %c0_i32_0 = arith.constant 0 : i32
    return %arg0, %arg1, %c0_i32 : i32, i32, i32
  }
  func.func @transform_1(%arg0: i32, %arg1: i32) -> (i32, i32) {
    %c0_i32 = arith.constant 0 : i32
    %c0_i32_0 = arith.constant 0 : i32
    %c0_i32_1 = arith.constant 0 : i32
    return %c0_i32, %c0_i32_0 : i32, i32
  }
  func.func @transform_2(%arg0: i32, %arg1: i32) -> (i32, i32) {
    %c0_i32 = arith.constant 0 : i32
    %c0_i32_0 = arith.constant 0 : i32
    %c0_i32_1 = arith.constant 0 : i32
    return %c0_i32, %c0_i32_0 : i32, i32
  }
  func.func @transform_3(%arg0: i32, %arg1: i32) -> (i32, i32, i32) {
    %c0_i32 = arith.constant 0 : i32
    %c0_i32_0 = arith.constant 0 : i32
    return %arg0, %c0_i32, %arg1 : i32, i32, i32
  }
}

</mosaic_0001>

<bundles_post_ra>
// kernel: tpu_custom_call.1
= control target key start
LH: loop header
LB: loop body
LE: loop exit
PB: predicated region body
PF: predicated region fallthrough
CT: control target
= control target key end

     0   :  { %8 = vsyncpa [#allocation3], 0  ;;  %s897_s0 = inlined_call_operand.hbm [shape: f32[2,16,32], index: 0, kind: input, shape index: {}]   ;;  %s898_s1 = inlined_call_operand.hbm [shape: bf16[32,128], index: 1, kind: input, shape index: {}]   ;;  %s899_s2 = inlined_call_operand.vmem [shape: f32[1,128], index: 2, kind: input, shape index: {}]   ;;  %s900_s3 = inlined_call_operand.vmem [shape: f32[2,64,8], index: 3, kind: output, shape index: {}]  }
   0x1   :  { %10 = vsyncpa [#allocation3 + $0x1], 0 }
   0x2   :  { %11 = vsyncpa [#allocation5], 0  ;;  %s765_s12 = smov 0   ;;  %s767_s13 = smov 0  }
   0x3   :  { %s769_s14 = smov 0   ;;  %s771_s15 = smov 0  }
   0x4   :  { %s773_s16 = smov 0   ;;  %s775_s17 = smov 0  }
   0x5 LB: > { %s524_s18 = sadd.s32 4294967295, %s738_s17   ;;  %p51_p0 = scmp.ne.s32.totalorder %s722_s13, %s718_s12  ;;  %s738_s17 = sphi %s775_s17, %s17_s17   ;;  %s734_s16 = sphi %s773_s16, %s909_s16   ;;  %s730_s15 = sphi %s771_s15, %s908_s15   ;;  %s726_s14 = sphi %s769_s14, %s907_s14   ;;  %s722_s13 = sphi %s767_s13, %s906_s13   ;;  %s718_s12 = sphi %s765_s12, %s905_s12  }
   0x6   : > { %p795_p1 = scmp.eq.s32.totalorder %s524_s18, 0  ;;  %p526_p2 = scmp.ge.s32.totalorder %s738_s17, 1 }
   0x7   : > { %p132_p3 = scmp.lt.s32.totalorder %s738_s17, 3  ;;  %s143_s23 = sshll.u32 %s898_s1, 4  ;;  %s144_s23 = int_to_ptr.hbm [resolvable:$true] %s143_s23 }
   0x8   : > { %p803_p4 = por %p795_p1, %p51_p0  ;;  %s740_s25 = smov [#allocation4]  }
   0x9   : > { %p810_p5 = pnand %p526_p2, %p132_p3  ;;  %s145_s26 = sshll.u32 %s740_s25, 4  ;;  %s146_s26 = int_to_ptr.vmem [resolvable:$true] %s145_s26 }
   0xa   : > { %s741_s27 = smov 64   ;;  %s742_s28 = smov 4  }
   0xb   : > { %p558_p6 = pneg %p810_p5  ;;  %s29_s29 = sadd.s32 1, %s734_s16 }
   0xc   : > { %p31_p8 = scmp.ge.s32.totalorder %s29_s29, 2  ;;  %s38_s30 = sadd.s32 1, %s726_s14 }
   0xd   : > { %p559_p7 = pnand %p558_p6, %p795_p1  ;;  %p45_p9 = scmp.ne.s32.totalorder %s726_s14, %s722_s13 }
   0xe   : > { %p46_p10 = scmp.eq.s32.totalorder %s738_s17, 0  ;;  %s911_s29 = smov (%p31_p8, %s29_s29), 0 }
   0xf   : > { %561 = dma.hbm_to_vmem [thread:$0]  (!%p559_p7), %s144_s23, 256, %s146_s26, [#allocation5], %s741_s27, %s741_s27, %s742_s28  }
  0x10   : > { %p825_p11 = por %p46_p10, %p45_p9  ;;  %p567_p12 = scmp.lt.s32.totalorder %s738_s17, 2 }
  0x11   : > { %s33_s5 = ssub.s32 %s734_s16, %s911_s29  ;;  %s162_s6 = sand.u32 1, %s726_s14  }
  0x12   : > { %p36_p13 = scmp.eq.s32.totalorder %s33_s5, 0  ;;  %s529_s7 = sshll.u32 %s162_s6, 4 }
  0x13   : > { %s548_s8 = sshll.u32 %s734_s16, 4  ;;  %s166_s21 = scalar_lea.vmem [#allocation2], %s529_s7 }
  0x14   : > { %s835_s9 = scalar_select %p36_p13, %s726_s14, %s38_s30  }
  0x15   : > { %s173_s12 = scalar_lea.hbm %s897_s0, %s548_s8  ;;  %s176_s22 = sshll.u32 %s166_s21, 4  ;;  %s177_s22 = int_to_ptr.vmem [resolvable:$true] %s176_s22 }
  0x16   : > { %s174_s18 = sshll.u32 %s173_s12, 4  ;;  %p563_p0 = pnand %p567_p12, %p825_p11  ;;  %s175_s18 = int_to_ptr.hbm [resolvable:$true] %s174_s18 }
  0x17   : > { %s163_s23 = scalar_lea.sflag [#allocation3], %s162_s6  ;;  %s743_s25 = smov 128  }
  0x18   : > { %s744_s26 = smov 8   ;;  %188 = sbr.rel (%p810_p5) target bundleno = 420 (0x1a4), region = 32 }
  0x19   : > { %565 = dma.hbm_to_vmem [thread:$0]  (!%p563_p0), %s175_s18, 256, %s177_s22, %s163_s23, %s743_s25, %s743_s25, %s744_s26  }
  0x1a   : > { %s190_s27 = sand.u32 (!%p810_p5), 1, %s722_s13  }
  0x1b   : > { %s533_s28 = sshll.u32 (!%p810_p5), %s190_s27, 4  ;;  %s191_s30 = scalar_lea.sflag (!%p810_p5), [#allocation3], %s190_s27 }
  0x1c   : > { %s194_s5 = scalar_lea.vmem (!%p810_p5), [#allocation2], %s533_s28 }
  0x1d   : > { %709 = dma.done.wait (%p803_p4), %s191_s30, 256  }
  0x1e   : > { %711 = vsyncadd (%p803_p4), %s191_s30, 4294967040 }
  0x1f   : > { %713 = dma.done.wait (%p795_p1), [#allocation5], 256  }
  0x20   : > { %715 = vsyncadd (%p795_p1), [#allocation5], 4294967040  ;;  %v551_v0 = vld [vmem:[#allocation4 + $0x8] sm:$0xff]  ;;  %v550_v1 = vld [vmem:[#allocation4] sm:$0xff]  ;;  %vm259_vm0 = vcmask 261120   ;;  %vm293_vm1 = vcmask 1041408  }
  0x21   : > { %269 = vmatpush.bf16.msra.mxu0 %v551_v0  ;;  %v236_v2 = vld [vmem:[%s194_s5] sm:$0xff]  ;;  %v237_v3 = vld [vmem:[%s194_s5 + $0x8] sm:$0xff]  ;;  %vm366_vm2 = vcmask 1041409   ;;  %vm368_vm3 = vcmask 1042434   ;;  %vm370_vm4 = vcmask 1043459   ;;  %vm372_vm5 = vcmask 1044484  }
  0x22   : > { %v238_v4 = vpack.c.bf16 %v237_v3, %v236_v2  ;;  %v623_v5 = vld [vmem:[%s899_s2] ss:$0 sm:$0xff]  ;;  %vm374_vm6 = vcmask 1045509   ;;  %vm376_vm7 = vcmask 1046534   ;;  %vm378_vm8 = vcmask 1047559   ;;  %p227_p1 = scmp.lt.s32.totalorder %s730_s15, 1 }
  0x23   : > { %vm413_vm9 = vcmask 64512  }
  0x24   : > { %s913_s15 = smov (!%p227_p1, %s730_s15), 1 }
  0x25   : > { %270 = vmatpush.bf16.msra.mxu0 %v550_v1  ;;  %s549_s19 = sshll.u32 %s913_s15, 6 }
  0x26   : > { %s234_s7 = scalar_lea.vmem %s900_s3, %s549_s19 }
  0x28   : > { %545 = vmatmul.msk.bf16.vlgmr.msra.gmra.mxu0 %vm259_vm0, %v238_v4 }
  0xa5   : > { %v272_v6 = vpop.f32.mrf.mxu0 }
  0xa6   : > { %v273_v7 = vadd.f32 %v623_v5, %v272_v6 }
  0xa8   : > { %v277_v8 = vmax.f32 %v273_v7, 0.0 }
  0xaa   : > { %v281_v9 = vrot.slane %v277_v8, 2  ;;  %v282_v10 = vrot.slane %v277_v8, 4  ;;  %v283_v11 = vrot.slane %v277_v8, 6  ;;  %v294_v12 = vsel %vm293_vm1, %v277_v8, 0.0 }
  0xab   : > { %v295_v13 = vrot.slane %v294_v12, 4 }
  0xac   : > { %v301_v14 = vsel %vm293_vm1, %v281_v9, 0.0  ;;  %v308_v15 = vsel %vm293_vm1, %v282_v10, 0.0  ;;  %v315_v16 = vsel %vm293_vm1, %v283_v11, 0.0 }
  0xad   : > { %v296_v17 = vadd.f32 %v295_v13, %v294_v12  ;;  %v302_v18 = vrot.slane %v301_v14, 4  ;;  %v309_v19 = vrot.slane %v308_v15, 4  ;;  %v316_v20 = vrot.slane %v315_v16, 4  ;;  %v274_v21 = vpop.f32.mrf.mxu0 }
  0xae   : > { %v275_v22 = vadd.f32 %v623_v5, %v274_v21 }
  0xaf   : > { %v297_v23 = vrot.slane %v296_v17, 2  ;;  %v303_v24 = vadd.f32 %v302_v18, %v301_v14  ;;  %v310_v25 = vadd.f32 %v309_v19, %v308_v15  ;;  %v317_v26 = vadd.f32 %v316_v20, %v315_v16 }
  0xb0   : > { %v278_v27 = vmax.f32 %v275_v22, 0.0 }
  0xb1   : > { %v298_v28 = vadd.f32 %v297_v23, %v296_v17  ;;  %v304_v29 = vrot.slane %v303_v24, 2  ;;  %v311_v30 = vrot.slane %v310_v25, 2  ;;  %v318_v31 = vrot.slane %v317_v26, 2 }
  0xb2   : > { %v284_v32 = vrot.slane %v278_v27, 2  ;;  %v285_v33 = vrot.slane %v278_v27, 4  ;;  %v286_v34 = vrot.slane %v278_v27, 6  ;;  %v322_v35 = vsel %vm293_vm1, %v278_v27, 0.0 }
  0xb3   : > { %v299_v36 = vrot.slane %v298_v28, 1  ;;  %v305_v37 = vadd.f32 %v304_v29, %v303_v24  ;;  %v312_v38 = vadd.f32 %v311_v30, %v310_v25  ;;  %v319_v39 = vadd.f32 %v318_v31, %v317_v26 }
  0xb4   : > { %v323_v40 = vrot.slane %v322_v35, 4  ;;  %v329_v41 = vsel %vm293_vm1, %v284_v32, 0.0  ;;  %v336_v42 = vsel %vm293_vm1, %v285_v33, 0.0  ;;  %v343_v43 = vsel %vm293_vm1, %v286_v34, 0.0 }
  0xb5   : > { %v300_v44 = vadd.f32 %v299_v36, %v298_v28  ;;  %v306_v45 = vrot.slane %v305_v37, 1  ;;  %v313_v46 = vrot.slane %v312_v38, 1  ;;  %v330_v47 = vrot.slane %v329_v41, 4 }
  0xb6   : > { %v324_v48 = vadd.f32 %v323_v40, %v322_v35  ;;  %v337_v49 = vrot.slane %v336_v42, 4  ;;  %v344_v50 = vrot.slane %v343_v43, 4  ;;  %v320_v54 = vrot.slane %v319_v39, 1 }
  0xb7   : > { %v307_v51 = vadd.f32 %v306_v45, %v305_v37  ;;  %v331_v52 = vadd.f32 %v330_v47, %v329_v41  ;;  %v314_v53 = vadd.f32 %v313_v46, %v312_v38  ;;  %v350_v58 = vmul.f32 0.5, %v300_v44 }
  0xb8   : > { %v325_v55 = vrot.slane %v324_v48, 2  ;;  %v338_v56 = vadd.f32 %v337_v49, %v336_v42  ;;  %v345_v57 = vadd.f32 %v344_v50, %v343_v43  ;;  %v321_v1 = vadd.f32 %v320_v54, %v319_v39 }
  0xb9   : > { %v351_v59 = vmul.f32 0.5, %v307_v51  ;;  %v332_v60 = vrot.slane %v331_v52, 2  ;;  %v352_v0 = vmul.f32 0.5, %v314_v53 }
  0xba   : > { %v326_v61 = vadd.f32 %v325_v55, %v324_v48  ;;  %v339_v62 = vrot.slane %v338_v56, 2  ;;  %v346_v63 = vrot.slane %v345_v57, 2  ;;  %v353_v13 = vmul.f32 0.5, %v321_v1 }
  0xbb   : > { %v333_v2 = vadd.f32 %v332_v60, %v331_v52  ;;  %v367_v3 = vsel %vm366_vm2, %v351_v59, %v350_v58 }
  0xbc   : > { %v327_v4 = vrot.slane %v326_v61, 1  ;;  %v340_v5 = vadd.f32 %v339_v62, %v338_v56  ;;  %v347_v6 = vadd.f32 %v346_v63, %v345_v57  ;;  %v369_v11 = vsel %vm368_vm3, %v352_v0, %v367_v3 }
  0xbd   : > { %v334_v7 = vrot.slane %v333_v2, 1  ;;  %v371_v18 = vsel %vm370_vm4, %v353_v13, %v369_v11 }
  0xbe   : > { %v328_v8 = vadd.f32 %v327_v4, %v326_v61  ;;  %v341_v9 = vrot.slane %v340_v5, 1  ;;  %v348_v10 = vrot.slane %v347_v6, 1 }
  0xbf   : > { %v335_v12 = vadd.f32 %v334_v7, %v333_v2 }
  0xc0   : > { %v342_v14 = vadd.f32 %v341_v9, %v340_v5  ;;  %v349_v15 = vadd.f32 %v348_v10, %v347_v6  ;;  %v354_v16 = vmul.f32 0.5, %v328_v8 }
  0xc1   : > { %v355_v17 = vmul.f32 0.5, %v335_v12 }
  0xc2   : > { %v356_v19 = vmul.f32 0.5, %v342_v14  ;;  %v373_v20 = vsel %vm372_vm5, %v354_v16, %v371_v18  ;;  %v357_v21 = vmul.f32 0.5, %v349_v15 }
  0xc3   : > { %v375_v22 = vsel %vm374_vm6, %v355_v17, %v373_v20 }
  0xc4   : > { %v377_v23 = vsel %vm376_vm7, %v356_v19, %v375_v22 }
  0xc5   : > { %v379_v24 = vsel %vm378_vm8, %v357_v21, %v377_v23 }
  0xc6   : > { %381 = vxpose.xlu0.b32.start.end [1/1] (short) (narrow) %v379_v24, 64 }
 0x16a   : > { %v397_v25 = vpop.trf.xlu0 }
 0x16b   : > { %414 = vst.msk [vmem:[%s234_s7] sm:$0xff] %vm413_vm9, %v397_v25 }
 0x172   : > { %v398_v26 = vpop.trf.xlu0 }
 0x173   : > { %415 = vst.msk [vmem:[%s234_s7 + $0x8] sm:$0xff] %vm413_vm9, %v398_v26 }
 0x17a   : > { %v399_v27 = vpop.trf.xlu0 }
 0x17b   : > { %416 = vst.msk [vmem:[%s234_s7 + $0x10] sm:$0xff] %vm413_vm9, %v399_v27 }
 0x182   : > { %v400_v28 = vpop.trf.xlu0 }
 0x183   : > { %417 = vst.msk [vmem:[%s234_s7 + $0x18] sm:$0xff] %vm413_vm9, %v400_v28 }
 0x18a   : > { %v401_v29 = vpop.trf.xlu0 }
 0x18b   : > { %418 = vst.msk [vmem:[%s234_s7 + $0x20] sm:$0xff] %vm413_vm9, %v401_v29 }
 0x192   : > { %v402_v30 = vpop.trf.xlu0 }
 0x193   : > { %419 = vst.msk [vmem:[%s234_s7 + $0x28] sm:$0xff] %vm413_vm9, %v402_v30 }
 0x19a   : > { %v403_v31 = vpop.trf.xlu0 }
 0x19b   : > { %420 = vst.msk [vmem:[%s234_s7 + $0x30] sm:$0xff] %vm413_vm9, %v403_v31 }
 0x1a2   : > { %v404_v32 = vpop.trf.xlu0 }
 0x1a3   : > { %421 = vst.msk [vmem:[%s234_s7 + $0x38] sm:$0xff] %vm413_vm9, %v404_v32 }
 0x1a4 PF: > { %s17_s17 = sadd.s32 1, %s738_s17   ;;  %s905_s12 = smov %s722_s13 }
 0x1a5   : > { %p14_p2 = scmp.ge.s32.totalorder %s17_s17, 4   ;;  %s906_s13 = smov %s726_s14 }
 0x1a6   : > { %s907_s14 = smov %s835_s9  ;;  %s908_s15 = smov %s734_s16 }
 0x1a7   : > { %s909_s16 = smov %s911_s29  ;;  %16 = sbr.rel (!%p14_p2) target bundleno = 5 (0x5), region = 76 }
 0x1ac   :  { %449 = vsyncpa [#allocation3], 1 }
 0x1ad   :  { %451 = vsyncpa [#allocation3 + $0x1], 1 }
 0x1ae   :  { %452 = vsyncpa [#allocation5], 1 }

</bundles_post_ra>
